<compile_context>
chip_gen: v5e
topology: v5e:2x2
jax: 0.10.0
libtpu: 0.0.40
codegen_flags: <defaults>
</compile_context>

<pallas_src>
import jax
import jax.numpy as jnp
from jax.experimental import pallas as pl
from jax.experimental.pallas import tpu as pltpu


_SUBLANE = 8
_LANE = 128
_DEF_TM = 512
_DEF_TN = 1024
_DEF_TK = 512
_FULL_K_MAX = 1024           # use tk = padded W when padded W <= this
_VMEM_BUDGET = 14 * 1024 * 1024  # stay under v5e's 16 MiB scoped-VMEM default


def _round_up(x: int, m: int) -> int:
    return ((x + m - 1) // m) * m


def _cdiv(a: int, b: int) -> int:
    return (a + b - 1) // b


def _choose_tile(size: int, max_tile: int, align: int) -> int:
    """Tile = multiple of `align`, <= max_tile, keeping padding waste low.

    If the whole (aligned) dim fits in one tile we use it directly (no
    over-padding beyond alignment); otherwise pick the largest power-of-two
    tile whose padding waste is <= 10%, falling back to min-waste.
    """
    size_al = _round_up(size, align)
    if size_al <= max_tile:
        return size_al
    best, best_waste = None, None
    t = max_tile
    while t >= align:
        waste = (_round_up(size, t) - size) / size
        if waste <= 0.10:
            return t
        if best is None or waste < best_waste:
            best, best_waste = t, waste
        t //= 2
    return best


def _fit_vmem(tm: int, tk: int, tn: int, compute_dtype) -> int:
    """Shrink tn so the double-buffered working set fits the smallest scoped
    VMEM default (v5e: 16 MiB).  With the current tile caps (<=10 MiB working
    set) this never triggers; it is a guard against future cap changes."""
    in_bytes = jnp.dtype(compute_dtype).itemsize
    while tn > _LANE:
        ws = 2 * (tm * tk * in_bytes + tk * tn * in_bytes + tm * tn * 4)
        if ws <= _VMEM_BUDGET:
            break
        tn = max(_LANE, ((tn // 2) // _LANE) * _LANE)
    return tn


def _make_kernel(k_axis: int, single_k: bool):
    """MXU matmul tile kernel; f32 accumulation directly in the output block."""
    if single_k:
        def kernel(a_ref, x_ref, o_ref):
            o_ref[...] = jnp.dot(
                a_ref[...], x_ref[...], preferred_element_type=jnp.float32
            )
    else:
        def kernel(a_ref, x_ref, o_ref):
            @pl.when(pl.program_id(k_axis) == 0)
            def _():
                o_ref[...] = jnp.zeros_like(o_ref)

            o_ref[...] += jnp.dot(
                a_ref[...], x_ref[...], preferred_element_type=jnp.float32
            )
    return kernel


def _prepare_A(A, compute_dtype=jnp.bfloat16, tm_max=_DEF_TM, tk_max=_DEF_TK):
    """Pad + cast the fixed adjacency once (hoisted out of the per-call path)."""
    H, W = A.shape
    tm = _choose_tile(H, tm_max, _SUBLANE)

    # v7x has two TensorCores; make sure the "parallel" H axis has >= 2 blocks
    # even for small graphs so both cores get work (costs <= 8 rows of pad and
    # one extra grid step per (j, k) on single-core chips).
    Hmin = _round_up(H, _SUBLANE)
    if Hmin >= 2 * _SUBLANE and _cdiv(Hmin, tm) == 1:
        tm = _round_up(_cdiv(Hmin, 2), _SUBLANE)

    # If the whole (padded) contraction dim fits one tile, take it: the k axis
    # then has a single step and A is never re-streamed across the N sweep.
    Wmin = _round_up(W, _LANE)
    tk = Wmin if Wmin <= _FULL_K_MAX else _choose_tile(W, tk_max, _LANE)

    Hp, Wp = _round_up(H, tm), _round_up(W, tk)
    A_p = A.astype(compute_dtype)
    if (Hp, Wp) != (H, W):
        A_p = jnp.pad(A_p, ((0, Hp - H), (0, Wp - W)))
    return A_p, tm, tk, H, W


def _gconv_prepared(A_p, tm, tk, H, W, x, *, tn_max=_DEF_TN, out_dtype=jnp.float32):
    B, W2, C = x.shape
    assert W2 == W, "A second dim must match x node dim"
    compute_dtype = A_p.dtype
    Hp, Wp = A_p.shape
    gm, gk = Hp // tm, Wp // tk
    single_k = gk == 1

    if C >= _LANE:
        # ---- Batched path (C already lane-dense): no HBM transpose of x/out.
        tn = _fit_vmem(tm, tk, _choose_tile(C, tn_max, _LANE), compute_dtype)
        Cp = _round_up(C, tn)
        x_p = x.astype(compute_dtype)
        if (Wp, Cp) != (W, C):
            x_p = jnp.pad(x_p, ((0, 0), (0, Wp - W), (0, Cp - C)))
        gn = Cp // tn

        out_p = pl.pallas_call(
            _make_kernel(k_axis=3, single_k=single_k),
            out_shape=jax.ShapeDtypeStruct((B, Hp, Cp), jnp.float32),
            grid_spec=pltpu.PrefetchScalarGridSpec(
                num_scalar_prefetch=0,
                grid=(B, gm, gn, gk),
                in_specs=[
                    # A block index is independent of b, j -> not re-DMA'd
                    # while the batch/N sweep runs.
                    pl.BlockSpec((tm, tk), lambda b, i, j, k: (i, k)),
                    pl.BlockSpec(
                        (pl.Squeezed(), tk, tn), lambda b, i, j, k: (b, k, j)
                    ),
                ],
                out_specs=pl.BlockSpec(
                    (pl.Squeezed(), tm, tn), lambda b, i, j, k: (b, i, j)
                ),
            ),
            compiler_params=pltpu.CompilerParams(
                dimension_semantics=("parallel", "parallel", "parallel", "arbitrary"),
            ),
        )(A_p, x_p)
        out = out_p[:, :H, :C]

    else:
        # ---- Folded path (C < 128): fold batch into lanes so stores stay
        # lane-dense (unmasked vst), one large matmul instead of B tiny ones.
        N = B * C
        tn = _fit_vmem(tm, tk, _choose_tile(N, tn_max, _LANE), compute_dtype)
        Np = _round_up(N, tn)
        x_f = jnp.transpose(x, (1, 0, 2)).reshape(W, N).astype(compute_dtype)
        if (Wp, Np) != (W, N):
            x_f = jnp.pad(x_f, ((0, Wp - W), (0, Np - N)))
        gn = Np // tn

        out_p = pl.pallas_call(
            _make_kernel(k_axis=2, single_k=single_k),
            out_shape=jax.ShapeDtypeStruct((Hp, Np), jnp.float32),
            grid_spec=pltpu.PrefetchScalarGridSpec(
                num_scalar_prefetch=0,
                grid=(gm, gn, gk),
                in_specs=[
                    pl.BlockSpec((tm, tk), lambda i, j, k: (i, k)),
                    pl.BlockSpec((tk, tn), lambda i, j, k: (k, j)),
                ],
                out_specs=pl.BlockSpec((tm, tn), lambda i, j, k: (i, j)),
            ),
            compiler_params=pltpu.CompilerParams(
                dimension_semantics=("parallel", "parallel", "arbitrary"),
            ),
        )(A_p, x_f)
        out = out_p[:H, :N].reshape(H, B, C)
        out = jnp.transpose(out, (1, 0, 2))

    return out.astype(out_dtype)


def make_gconv(A, *, compute_dtype=jnp.bfloat16):
    """Prepare (pad + bf16-cast) the fixed adjacency once; returns f(x)."""
    A_p, tm, tk, H, W = _prepare_A(A, compute_dtype)

    def apply(x):
        return _gconv_prepared(A_p, tm, tk, H, W, x)

    return apply


def gconv(A, x, *, compute_dtype=jnp.bfloat16):
    """einsum('hw,bwc->bhc', A, x). Per-call convenience wrapper.

    (`.contiguous()` in the PyTorch module is a layout no-op in JAX.)
    Pass compute_dtype=jnp.float32 if bit-level parity with f32 torch matters.
    """
    A_p, tm, tk, H, W = _prepare_A(A, compute_dtype)
    return _gconv_prepared(A_p, tm, tk, H, W, x)


if __name__ == "__main__":
    key = jax.random.PRNGKey(0)
    k_a, k_x1, k_x2 = jax.random.split(key, 3)

    # Test 1: small channel count (C < 128) -> folded (batch-into-lanes) path,
    # adjacency prepared once via make_gconv (hoisted pad + bf16 cast).
    B, H, W, C = 2, 16, 16, 32
    A = jax.random.normal(k_a, (H, W), dtype=jnp.float32)
    x = jax.random.normal(k_x1, (B, W, C), dtype=jnp.float32)

    gconv_fn = jax.jit(make_gconv(A))
    out = jax.block_until_ready(gconv_fn(x))
    assert out.shape == (B, H, C)

    ref_bf16 = jnp.einsum(
        "hw,bwc->bhc",
        A.astype(jnp.bfloat16), x.astype(jnp.bfloat16),
        preferred_element_type=jnp.float32,
    )
    ref_f32 = jnp.einsum("hw,bwc->bhc", A, x)
    assert jnp.allclose(out, ref_bf16, atol=2e-3, rtol=2e-3)
    assert jnp.allclose(out, ref_f32, atol=1e-1, rtol=1e-1)

    # Test 2: lane-wide channels (C >= 128) -> batched path (no HBM transpose).
    C2 = 128
    x2 = jax.random.normal(k_x2, (B, W, C2), dtype=jnp.float32)
    out2 = jax.block_until_ready(gconv(A, x2))
    assert out2.shape == (B, H, C2)

    ref2_bf16 = jnp.einsum(
        "hw,bwc->bhc",
        A.astype(jnp.bfloat16), x2.astype(jnp.bfloat16),
        preferred_element_type=jnp.float32,
    )
    ref2_f32 = jnp.einsum("hw,bwc->bhc", A, x2)
    assert jnp.allclose(out2, ref2_bf16, atol=2e-3, rtol=2e-3)
    assert jnp.allclose(out2, ref2_f32, atol=1e-1, rtol=1e-1)

    print("KERNEL_OK")
</pallas_src>

<mosaic_0001>
module attributes {stable_mosaic.version = 11 : i64} {
  func.func @kernel(%arg0: i32, %arg1: i32, %arg2: i32, %arg3: memref<8x128xbf16, #tpu.memory_space<vmem>>, %arg4: memref<128x128xbf16, #tpu.memory_space<vmem>>, %arg5: memref<8x128xf32, #tpu.memory_space<vmem>>) attributes {dimension_semantics = [#tpu.dimension_semantics<parallel>, #tpu.dimension_semantics<parallel>, #tpu.dimension_semantics<arbitrary>], iteration_bounds = array<i64: 2, 1, 1>, scalar_prefetch = 0 : i64, scratch_operands = 0 : i64, tpu.core_type = #tpu.core_type<tc>, window_params = [{transform_indices = @transform_0, window_bounds = array<i64: 8, 128>}, {transform_indices = @transform_1, window_bounds = array<i64: 128, 128>}, {transform_indices = @transform_2, window_bounds = array<i64: 8, 128>}]} {
    %c0 = arith.constant 0 : index
    %c0_0 = arith.constant 0 : index
    %0 = vector.load %arg3[%c0, %c0_0] : memref<8x128xbf16, #tpu.memory_space<vmem>>, vector<8x128xbf16>
    %c0_1 = arith.constant 0 : index
    %c0_2 = arith.constant 0 : index
    %1 = vector.load %arg4[%c0_1, %c0_2] : memref<128x128xbf16, #tpu.memory_space<vmem>>, vector<128x128xbf16>
    %cst = arith.constant dense<0.000000e+00> : vector<8x128xf32>
    %2 = tpu.matmul %0, %1, %cst {dimension_numbers = #tpu.dot_dimension_numbers<[1], [0], [0], [1], [0, 0, 1, 1], [], []>} : vector<8x128xbf16>, vector<128x128xbf16>, vector<8x128xf32> -> vector<8x128xf32>
    %c0_3 = arith.constant 0 : index
    %c0_4 = arith.constant 0 : index
    %3 = vector.load %arg5[%c0_3, %c0_4] : memref<8x128xf32, #tpu.memory_space<vmem>>, vector<8x128xf32>
    tpu.vector_store %arg5[%c0_3, %c0_4], %2 {strides = array<i32>} : memref<8x128xf32, #tpu.memory_space<vmem>>, vector<8x128xf32>,
    return
  }
  func.func @transform_0(%arg0: i32, %arg1: i32, %arg2: i32) -> (i32, i32) {
    %c0_i32 = arith.constant 0 : i32
    return %arg0, %arg2 : i32, i32
  }
  func.func @transform_1(%arg0: i32, %arg1: i32, %arg2: i32) -> (i32, i32) {
    %c0_i32 = arith.constant 0 : i32
    return %arg2, %arg1 : i32, i32
  }
  func.func @transform_2(%arg0: i32, %arg1: i32, %arg2: i32) -> (i32, i32) {
    %c0_i32 = arith.constant 0 : i32
    return %arg0, %arg1 : i32, i32
  }
}

</mosaic_0001>

<bundles_post_ra>
// kernel: apply.1
= control target key start
LH: loop header
LB: loop body
LE: loop exit
PB: predicated region body
PF: predicated region fallthrough
CT: control target
= control target key end

     0   :  { %s498_s9 = smov 0   ;;  %s500_s10 = smov 0   ;;  %s555_s0 = inlined_call_operand.vmem [shape: bf16[16,128], index: 0, kind: input, shape index: {}]   ;;  %s556_s1 = inlined_call_operand.vmem [shape: bf16[128,128], index: 1, kind: input, shape index: {}]   ;;  %s557_s2 = inlined_call_operand.vmem [shape: f32[16,128], index: 2, kind: output, shape index: {}]  }
   0x1   :  { %s502_s11 = smov 0  }
   0x2 LB: > { %s31_s12 = sadd.s32 1, %s477_s10  ;;  %p390_p0 = scmp.ge.s32.totalorder %s481_s11, 1  ;;  %s481_s11 = sphi %s502_s11, %s12_s11   ;;  %s477_s10 = sphi %s500_s10, %s559_s10   ;;  %s473_s9 = sphi %s498_s9, %s558_s9  }
   0x3   : > { %p33_p1 = scmp.ge.s32.totalorder %s31_s12, 2  ;;  %p153_p2 = scmp.lt.s32.totalorder %s481_s11, 3 }
   0x5   : > { %s561_s12 = smov (%p33_p1, %s31_s12), 0  ;;  %p154_p3 = pnand %p390_p0, %p153_p2 }
   0x6   : > { %p187_p4 = scmp.lt.s32.totalorder (!%p154_p3), %s473_s9, 1 }
   0x7   : > { %157 = sbr.rel (%p154_p3) target bundleno = 178 (0xb2), region = 28 }
   0xc   : > { %v434_v0 = vld [vmem:[%s556_s1 + $0x38] sm:$0xff]  ;;  %v433_v1 = vld [vmem:[%s556_s1 + $0x30] sm:$0xff]  ;;  %v432_v2 = vld [vmem:[%s556_s1 + $0x28] sm:$0xff]  ;;  %s563_s9 = smov (!%p187_p4, %s473_s9), 1 }
   0xd   : > { %275 = vmatpush.bf16.msra.mxu0 %v434_v0  ;;  %v431_v3 = vld [vmem:[%s556_s1 + $0x20] sm:$0xff]  ;;  %v430_v4 = vld [vmem:[%s556_s1 + $0x18] sm:$0xff]  ;;  %v429_v5 = vld [vmem:[%s556_s1 + $0x10] sm:$0xff]  ;;  %s391_s27 = sshll.u32 %s563_s9, 2  ;;  %s392_s5 = sshll.u32 %s563_s9, 3 }
   0xe   : > { %v428_v6 = vld [vmem:[%s556_s1 + $0x8] sm:$0xff]  ;;  %v427_v7 = vld [vmem:[%s556_s1] sm:$0xff]  ;;  %s193_s4 = scalar_lea.vmem %s555_s0, %s391_s27  ;;  %s209_s8 = scalar_lea.vmem %s557_s2, %s392_s5 }
   0xf   : > { %v210_v8 = vld [vmem:[%s193_s4] sm:$0xf] }
  0x11   : > { %276 = vmatpush.bf16.msra.mxu0 %v433_v1 }
  0x15   : > { %277 = vmatpush.bf16.msra.mxu0 %v432_v2 }
  0x19   : > { %278 = vmatpush.bf16.msra.mxu0 %v431_v3 }
  0x1d   : > { %279 = vmatpush.bf16.msra.mxu0 %v430_v4 }
  0x21   : > { %280 = vmatpush.bf16.msra.mxu0 %v429_v5 }
  0x25   : > { %281 = vmatpush.bf16.msra.mxu0 %v428_v6 }
  0x29   : > { %282 = vmatpush.bf16.msra.mxu0 %v427_v7 }
  0x2c   : > { %283 = vmatmul.bf16.vlgmr.msra.gmra.mxu0 %v210_v8 }
  0xa9   : > { %v284_v9 = vpop.f32.mrf.mxu0 }
  0xaa   : > { %288 = vst [vmem:[%s209_s8] sm:$0xff] %v284_v9 }
  0xb1   : > { %v286_v10 = vpop.f32.mrf.mxu0 }
  0xb2 PF: > { %s12_s11 = sadd.s32 1, %s481_s11   ;;  %s558_s9 = smov %s477_s10 }
  0xb3   : > { %p9_p5 = scmp.ge.s32.totalorder %s12_s11, 4   ;;  %s559_s10 = smov %s561_s12 }
  0xb5   :  { %11 = sbr.rel (!%p9_p5) target bundleno = 2 (0x2), region = 61 }

</bundles_post_ra>
